<compile_context>
chip_gen: v7x
topology: tpu7x:2x2x1
jax: 0.10.0
libtpu: 0.0.40
codegen_flags: <defaults>
</compile_context>

<pallas_src>
import functools
import itertools

import numpy as np
import jax
import jax.numpy as jnp
from jax import lax
from jax.experimental import pallas as pl
from jax.experimental.pallas import tpu as pltpu

_SUBLANE = 8
_LANE = 128

# slab row indices for the masked-cost kernel
_ROW_A_B, _ROW_A_D, _ROW_B_B, _ROW_B_D, _ROW_PAIRED, _ROW_VALID = 0, 1, 2, 3, 4, 5


def _round_up(n, m):
    return max(m, ((n + m - 1) // m) * m)


def _pow_fn(p):
    if float(p) == int(p) and p >= 1:
        return lambda x: lax.integer_pow(x, int(p))
    return lambda x: x ** jnp.float32(p)


def _tile_config():
    """Per-generation cost-matrix tile (bm, bn) and optional scoped-VMEM override."""
    try:
        kind = jax.devices()[0].device_kind.lower()
    except Exception:
        kind = ""
    if "v6" in kind:
        # 8 MiB f32 output block (16 MiB double-buffered); plenty of headroom on
        # v6e's 128 MiB physical VMEM, raise the scoped limit explicitly.
        return 1024, 2048, 64 << 20
    if "v7" in kind or "tpu7" in kind:
        # 4 MiB block (8 MiB double-buffered) fits v7x's 32 MiB scoped default.
        return 512, 2048, None
    # v5e / unknown: 1 MiB block, stays well under the 16 MiB scoped default.
    return 256, 1024, None


_TM, _TN, _VMEM_LIMIT = _tile_config()


# ----------------------------------------------------------------------------
# Kernel 1: pairwise (L1 distance)**p matrix between two diagrams
#           (internal_p=1, order=p fused on-device).
# ----------------------------------------------------------------------------
def _make_l1p_kernel(p):
    powf = _pow_fn(p)

    def kernel(d1_ref, d2t_ref, c_ref):
        b1 = d1_ref[:, 0:1]        # (bm, 1) births of dgm1
        de1 = d1_ref[:, 1:2]       # (bm, 1) deaths of dgm1
        b2 = d2t_ref[0:1, :]       # (1, bn) births of dgm2 (lane-dense)
        de2 = d2t_ref[1:2, :]      # (1, bn) deaths of dgm2
        # kernel is HBM-write bound, so the fused **p rides in idle VPU/EUP slots;
        # base is >= 0 so fractional p is NaN-safe.
        c_ref[...] = powf(jnp.abs(b1 - b2) + jnp.abs(de1 - de2))

    return kernel


@functools.partial(jax.jit, static_argnames=("p",))
def _l1p_cost_matrix(dgm1, dgm2, *, p):
    """Device-side (n1, n2) matrix of (L1 dist)**p between diagram points.

    Padding, the dgm2 transpose and the final unpad slice are fused under this
    jit, so only the exact n1*n2 floats are transferred to the host."""
    n1, n2 = dgm1.shape[0], dgm2.shape[0]
    # Minimal (8, 128) padding; partial edge tiles are handled by pl.cdiv grid
    # with masked stores -> no extra HBM writes beyond one vreg row/col.
    n1p = _round_up(n1, _SUBLANE)
    n2p = _round_up(n2, _LANE)
    bm, bn = min(n1p, _TM), min(n2p, _TN)

    d1 = jnp.pad(dgm1.astype(jnp.float32), ((0, n1p - n1), (0, 0)))      # (n1p, 2)
    d2t = jnp.pad(dgm2.astype(jnp.float32).T, ((0, 0), (0, n2p - n2)))   # (2, n2p)

    cp_kwargs = dict(dimension_semantics=("parallel", "parallel"))
    if _VMEM_LIMIT is not None:
        cp_kwargs["vmem_limit_bytes"] = _VMEM_LIMIT

    out = pl.pallas_call(
        _make_l1p_kernel(p),
        out_shape=jax.ShapeDtypeStruct((n1p, n2p), jnp.float32),
        grid=(pl.cdiv(n1p, bm), pl.cdiv(n2p, bn)),
        in_specs=[pl.BlockSpec((bm, 2), lambda i, j: (i, 0)),
                  pl.BlockSpec((2, bn), lambda i, j: (0, j))],
        out_specs=pl.BlockSpec((bm, bn), lambda i, j: (i, j)),
        compiler_params=pltpu.CompilerParams(**cp_kwargs),
    )(d1, d2t)
    if (n1p, n2p) != (n1, n2):
        out = out[:n1, :n2]   # device-side unpad: exactly n1*n2 floats go to host
    return out


# ----------------------------------------------------------------------------
# Kernel 2: masked per-row |diff| / signed-diff, p-th power, lane-dense sum.
#   paired rows:   (|b1-b2| + |d1-d2|)**p
#   unpaired rows: (a - b)**p       (signed, faithful to torch.pow in the spec)
# ----------------------------------------------------------------------------
def _make_cost_kernel(p):
    powf = _pow_fn(p)

    def kernel(slab_ref, out_ref):
        # (1, Mp) lane-dense row slices; the birth/death reduction is a plain
        # VPU add of two rows (no XLU cross-lane reduce over a 2-wide vreg).
        da = slab_ref[_ROW_A_B:_ROW_A_B + 1, :] - slab_ref[_ROW_B_B:_ROW_B_B + 1, :]
        dd = slab_ref[_ROW_A_D:_ROW_A_D + 1, :] - slab_ref[_ROW_B_D:_ROW_B_D + 1, :]
        paired = slab_ref[_ROW_PAIRED:_ROW_PAIRED + 1, :]
        valid = slab_ref[_ROW_VALID:_ROW_VALID + 1, :]
        da = jnp.where(paired > 0.5, jnp.abs(da), da)
        dd = jnp.where(paired > 0.5, jnp.abs(dd), dd)
        row = (da + dd) * valid          # zero pad lanes before pow; 0**p == 0 for p > 0
        out_ref[0, 0] = jnp.sum(powf(row))

    return kernel


def _masked_cost_call(slab, *, p):
    # Scalar result kept as a (1,1) VMEM block (known-good lowering); the single
    # masked 1-lane store is negligible.
    # TODO(synk): tile along the lane axis with a pl.when-accumulated scalar if
    #             matchings ever exceed ~0.5M points (single-block VMEM limit).
    mp = slab.shape[1]
    out = pl.pallas_call(
        _make_cost_kernel(p),
        out_shape=jax.ShapeDtypeStruct((1, 1), jnp.float32),
        grid=(1,),
        in_specs=[pl.BlockSpec((8, mp), lambda i: (0, 0))],
        out_specs=pl.BlockSpec((1, 1), lambda i: (0, 0)),
    )(slab)
    return out[0, 0]


# ----------------------------------------------------------------------------
# Host-side optimal matching (gudhi wasserstein_distance(matching=True,
# order=p, internal_p=1) equivalent via Hungarian assignment).
# All inputs are already raised to the p-th power (C**p fused on-device).
# TODO(synk): the combinatorial optimal-transport matching is data-dependent
#             host logic with no clean Pallas equivalent.
# ----------------------------------------------------------------------------
def _optimal_matching_from_pow(Cp, diag1_p, diag2_p):
    n1, n2 = Cp.shape
    n = n1 + n2
    M = np.zeros((n, n), dtype=np.float64)
    M[:n1, :n2] = np.asarray(Cp, np.float64)
    M[:n1, n2:] = np.asarray(diag1_p, np.float64)[:, None]
    M[n1:, :n2] = np.asarray(diag2_p, np.float64)[None, :]
    try:
        from scipy.optimize import linear_sum_assignment
        _, best = linear_sum_assignment(M)
        best = np.asarray(best, np.int64)
    except ImportError:
        # brute-force fallback (only reachable for tiny diagrams w/o scipy)
        perms = np.array(list(itertools.permutations(range(n))), dtype=np.int64)
        costs = M[np.arange(n)[None, :], perms].sum(axis=1)
        best = perms[int(np.argmin(costs))]
    rows = []
    for i in range(n1):
        j = int(best[i])
        rows.append((i, j) if j < n2 else (i, -1))
    for k in range(n2):
        j = int(best[n1 + k])
        if j < n2:
            rows.append((-1, j))
    return np.array(rows, dtype=np.int64)


# ----------------------------------------------------------------------------
# Host slab builders (pure numpy -> one device upload each)
# ----------------------------------------------------------------------------
def _build_slab_from_matching(matching, d1np, d2np):
    m = matching.shape[0]
    mp = _round_up(m, _LANE)
    slab = np.zeros((8, mp), np.float32)
    mi, mj = matching[:, 0], matching[:, 1]
    unp1 = mi == -1
    unp2 = mj == -1
    paired = (~unp1) & (~unp2)
    a_b = np.zeros(m, np.float32)
    a_d = np.zeros(m, np.float32)
    b_b = np.zeros(m, np.float32)
    b_d = np.zeros(m, np.float32)
    if paired.any():
        a_b[paired] = d1np[mi[paired], 0]
        a_d[paired] = d1np[mi[paired], 1]
        b_b[paired] = d2np[mj[paired], 0]
        b_d[paired] = d2np[mj[paired], 1]
    # faithful to the torch module: index -1 selects the LAST diagram row
    if unp1.any():
        a_b[unp1] = d1np[-1, 1]
        b_b[unp1] = d1np[-1, 0]
    if unp2.any():
        a_b[unp2] = d2np[-1, 1]
        b_b[unp2] = d1np[-1, 0]
    slab[_ROW_A_B, :m] = a_b
    slab[_ROW_A_D, :m] = a_d
    slab[_ROW_B_B, :m] = b_b
    slab[_ROW_B_D, :m] = b_d
    slab[_ROW_PAIRED, :m] = paired.astype(np.float32)
    slab[_ROW_VALID, :m] = 1.0
    return slab


def _build_slab_diag_only(dgm_np):
    n = dgm_np.shape[0]
    mp = _round_up(n, _LANE)
    slab = np.zeros((8, mp), np.float32)
    slab[_ROW_A_B, :n] = dgm_np[:, 1]   # deaths
    slab[_ROW_B_B, :n] = dgm_np[:, 0]   # births
    slab[_ROW_VALID, :n] = 1.0          # unpaired -> signed (d - b)**p
    return slab


# ----------------------------------------------------------------------------
# Module equivalent
# ----------------------------------------------------------------------------
class WassersteinDistance:
    """p-Wasserstein distance (to the p power) between two persistence diagrams;
    reproduces the PyTorch module's forward (including its use of index -1 ->
    last row for unpaired entries)."""

    def __init__(self, p):
        self.p = p
        self._cost_sum = jax.jit(functools.partial(_masked_cost_call, p=p))

    def __call__(self, dgm1, dgm2):
        dgm1 = jnp.asarray(dgm1, jnp.float32)
        dgm2 = jnp.asarray(dgm2, jnp.float32)
        n1, n2 = dgm1.shape[0], dgm2.shape[0]
        if n1 == 0:
            if n2 == 0:
                return jnp.float32(0.0)
            return self._cost_sum(jnp.asarray(_build_slab_diag_only(np.asarray(dgm2))))
        if n2 == 0:
            return self._cost_sum(jnp.asarray(_build_slab_diag_only(np.asarray(dgm1))))

        # hot path 1: (L1 dist)**p matrix (Pallas, pow fused, minimal padding,
        # device-side unpad -> exactly n1*n2 floats cross PCIe)
        Cp = np.asarray(_l1p_cost_matrix(dgm1, dgm2, p=self.p))
        d1np = np.asarray(dgm1)
        d2np = np.asarray(dgm2)
        diag1_p = (d1np[:, 1].astype(np.float64) - d1np[:, 0]) ** self.p
        diag2_p = (d2np[:, 1].astype(np.float64) - d2np[:, 0]) ** self.p
        matching = _optimal_matching_from_pow(Cp, diag1_p, diag2_p)

        # hot path 2: packed masked abs-diff / pow / sum reduction (Pallas)
        slab = _build_slab_from_matching(matching, d1np, d2np)
        return self._cost_sum(jnp.asarray(slab))


def _reference_forward(d1np, d2np, p):
    """Pure numpy replica of the PyTorch module for validation."""
    if d1np.shape[0] == 0:
        return float(np.sum((d2np[:, 1] - d2np[:, 0]) ** p))
    if d2np.shape[0] == 0:
        return float(np.sum((d1np[:, 1] - d1np[:, 0]) ** p))
    C = np.abs(d1np[:, None, 0] - d2np[None, :, 0]) + \
        np.abs(d1np[:, None, 1] - d2np[None, :, 1])
    Cp = C.astype(np.float64) ** p
    diag1_p = (d1np[:, 1].astype(np.float64) - d1np[:, 0]) ** p
    diag2_p = (d2np[:, 1].astype(np.float64) - d2np[:, 0]) ** p
    matching = _optimal_matching_from_pow(Cp, diag1_p, diag2_p)
    cost = 0.0
    for i, j in matching:
        if i == -1:
            cost += (d1np[-1, 1] - d1np[-1, 0]) ** p
        elif j == -1:
            cost += (d2np[-1, 1] - d1np[-1, 0]) ** p
        else:
            cost += (np.abs(d1np[i] - d2np[j]).sum()) ** p
    return float(cost)


if __name__ == "__main__":
    key = jax.random.PRNGKey(0)
    k1, k2, k3, k4 = jax.random.split(key, 4)

    # small persistence diagrams: dgm1 has 4 points, dgm2 has 3 points
    b1 = jax.random.uniform(k1, (4,), jnp.float32)
    dgm1 = jnp.stack([b1, b1 + 0.1 + jax.random.uniform(k2, (4,), jnp.float32)], axis=1)
    b2 = jax.random.uniform(k3, (3,), jnp.float32)
    dgm2 = jnp.stack([b2, b2 + 0.1 + jax.random.uniform(k4, (3,), jnp.float32)], axis=1)

    wd = WassersteinDistance(p=2.0)

    out = jax.block_until_ready(wd(dgm1, dgm2))
    ref = _reference_forward(np.asarray(dgm1), np.asarray(dgm2), 2.0)
    assert np.allclose(float(out), ref, rtol=1e-4, atol=1e-5), (float(out), ref)

    # empty-diagram branch
    out_empty = jax.block_until_ready(wd(jnp.zeros((0, 2), jnp.float32), dgm2))
    ref_empty = _reference_forward(np.zeros((0, 2), np.float32), np.asarray(dgm2), 2.0)
    assert np.allclose(float(out_empty), ref_empty, rtol=1e-4, atol=1e-5), \
        (float(out_empty), ref_empty)

    # medium diagrams: exercises the tiled cost-matrix grid (partial edge blocks
    # on the small default tile config); validated directly against numpy.
    k5, k6, k7, k8 = jax.random.split(jax.random.PRNGKey(1), 4)
    b1m = jax.random.uniform(k5, (300,), jnp.float32)
    dgm1m = jnp.stack([b1m, b1m + 0.05 + jax.random.uniform(k6, (300,), jnp.float32)], axis=1)
    b2m = jax.random.uniform(k7, (150,), jnp.float32)
    dgm2m = jnp.stack([b2m, b2m + 0.05 + jax.random.uniform(k8, (150,), jnp.float32)], axis=1)
    Cp_dev = np.asarray(jax.block_until_ready(_l1p_cost_matrix(dgm1m, dgm2m, p=2.0)))
    d1m, d2m = np.asarray(dgm1m), np.asarray(dgm2m)
    Cp_ref = (np.abs(d1m[:, None, 0] - d2m[None, :, 0]) +
              np.abs(d1m[:, None, 1] - d2m[None, :, 1])) ** 2.0
    assert Cp_dev.shape == (300, 150), Cp_dev.shape
    assert np.allclose(Cp_dev, Cp_ref, rtol=1e-5, atol=1e-5), \
        float(np.max(np.abs(Cp_dev - Cp_ref)))

    print("KERNEL_OK")
</pallas_src>

<mosaic_0001>
module attributes {stable_mosaic.version = 11 : i64} {
  func.func @kernel(%arg0: i32, %arg1: i32, %arg2: memref<8x2xf32, #tpu.memory_space<vmem>>, %arg3: memref<2x128xf32, #tpu.memory_space<vmem>>, %arg4: memref<8x128xf32, #tpu.memory_space<vmem>>) attributes {dimension_semantics = [#tpu.dimension_semantics<parallel>, #tpu.dimension_semantics<parallel>], iteration_bounds = array<i64: 1, 1>, scalar_prefetch = 0 : i64, scratch_operands = 0 : i64, tpu.core_type = #tpu.core_type<tc>, window_params = [{transform_indices = @transform_0, window_bounds = array<i64: 8, 2>}, {transform_indices = @transform_1, window_bounds = array<i64: 2, 128>}, {transform_indices = @transform_2, window_bounds = array<i64: 8, 128>}]} {
    %c0 = arith.constant 0 : index
    %c0_0 = arith.constant 0 : index
    %0 = vector.load %arg2[%c0, %c0_0] : memref<8x2xf32, #tpu.memory_space<vmem>>, vector<8x1xf32>
    %c0_1 = arith.constant 0 : index
    %c1 = arith.constant 1 : index
    %1 = vector.load %arg2[%c0_1, %c1] : memref<8x2xf32, #tpu.memory_space<vmem>>, vector<8x1xf32>
    %c0_2 = arith.constant 0 : index
    %c0_3 = arith.constant 0 : index
    %2 = vector.load %arg3[%c0_2, %c0_3] : memref<2x128xf32, #tpu.memory_space<vmem>>, vector<1x128xf32>
    %c1_4 = arith.constant 1 : index
    %c0_5 = arith.constant 0 : index
    %3 = vector.load %arg3[%c1_4, %c0_5] : memref<2x128xf32, #tpu.memory_space<vmem>>, vector<1x128xf32>
    %4 = vector.broadcast %0 : vector<8x1xf32> to vector<8x128xf32>
    %5 = vector.broadcast %2 : vector<1x128xf32> to vector<8x128xf32>
    %6 = arith.subf %4, %5 : vector<8x128xf32>
    %7 = math.absf %6 : vector<8x128xf32>
    %8 = vector.broadcast %1 : vector<8x1xf32> to vector<8x128xf32>
    %9 = vector.broadcast %3 : vector<1x128xf32> to vector<8x128xf32>
    %10 = arith.subf %8, %9 : vector<8x128xf32>
    %11 = math.absf %10 : vector<8x128xf32>
    %12 = arith.addf %7, %11 : vector<8x128xf32>
    %13 = arith.mulf %12, %12 : vector<8x128xf32>
    %c0_6 = arith.constant 0 : index
    %c0_7 = arith.constant 0 : index
    %14 = vector.load %arg4[%c0_6, %c0_7] : memref<8x128xf32, #tpu.memory_space<vmem>>, vector<8x128xf32>
    tpu.vector_store %arg4[%c0_6, %c0_7], %13 {strides = array<i32>} : memref<8x128xf32, #tpu.memory_space<vmem>>, vector<8x128xf32>,
    return
  }
  func.func @transform_0(%arg0: i32, %arg1: i32) -> (i32, i32) {
    %c0_i32 = arith.constant 0 : i32
    %c0_i32_0 = arith.constant 0 : i32
    return %arg0, %c0_i32 : i32, i32
  }
  func.func @transform_1(%arg0: i32, %arg1: i32) -> (i32, i32) {
    %c0_i32 = arith.constant 0 : i32
    %c0_i32_0 = arith.constant 0 : i32
    return %c0_i32, %arg1 : i32, i32
  }
  func.func @transform_2(%arg0: i32, %arg1: i32) -> (i32, i32) {
    %c0_i32 = arith.constant 0 : i32
    return %arg0, %arg1 : i32, i32
  }
}

</mosaic_0001>

<bundles_post_ra>
// kernel: _l1p_cost_matrix.1
= control target key start
LH: loop header
LB: loop body
LE: loop exit
PB: predicated region body
PF: predicated region fallthrough
CT: control target
= control target key end

     0   :  { %v48_v0 = vmov 0   ;;  %v49_v2 = vmov 1   ;;  %s77_s0 = inlined_call_operand.vmem [shape: f32[8,2], index: 0, kind: input, shape index: {}]   ;;  %s78_s1 = inlined_call_operand.vmem [shape: f32[2,128], index: 1, kind: input, shape index: {}]   ;;  %s79_s2 = inlined_call_operand.vmem [shape: f32[8,128], index: 2, kind: output, shape index: {}]  }
   0x1   :  { %46 = vset.pattern.permute.xlu0 %v48_v0  ;;  %v11_v1 = vld [vmem:[%s77_s0] sm:$0xff] }
   0x2   :  { %16 = vperm.xlu0 %46, %v11_v1   ;;  %v42_v4 = vld [vmem:[%s78_s1] ss:$0 sm:$0xff]  ;;  %v43_v5 = vld [vmem:[%s78_s1 + $0x1] ss:$0 sm:$0xff] }
   0x6   :  { %47 = vset.pattern.permute.xlu0 %v49_v2 }
   0x7   :  { %26 = vperm.xlu0 %47, %v11_v1  }
  0x81   :  { %v17_v3 = vpop.permute.xlu0 %16 }
  0x82   :  { %v23_v6 = vsub.f32 %v17_v3, %v42_v4 }
  0x84   :  { %v24_v9 = vand.u32 2147483647, %v23_v6 }
  0x86   :  { %v27_v7 = vpop.permute.xlu0 %26 }
  0x87   :  { %v33_v8 = vsub.f32 %v27_v7, %v43_v5 }
  0x89   :  { %v34_v10 = vand.u32 2147483647, %v33_v8 }
  0x8b   :  { %v35_v11 = vadd.f32 %v34_v10, %v24_v9 }
  0x8d   :  { %v36_v12 = vmul.f32 %v35_v11, %v35_v11 }
  0x8f   :  { %37 = vst [vmem:[%s79_s2] sm:$0xff] %v36_v12 }

</bundles_post_ra>
